<compile_context>
chip_gen: v7x
topology: tpu7x:2x2x1
jax: 0.10.0
libtpu: 0.0.40
codegen_flags: <defaults>
</compile_context>

<pallas_src>
import math

import jax
import jax.numpy as jnp
from jax.experimental import pallas as pl
from jax.experimental.pallas import tpu as pltpu


def _round_up(x, m):
    return ((x + m - 1) // m) * m


def _sigmoid(x):
    # EUP-only formulation (tanh runs on the EUP slot; no VPU divide).
    return 0.5 * (jnp.tanh(0.5 * x) + 1.0)


def actor_kernel(x_ref,
                 w1_ref, b1_ref,
                 w2_ref, b2_ref,
                 w3_ref, b3_ref,
                 w4_ref, b4_ref,
                 out_ref):
    # x arrives f32; in-kernel cast to bf16 is a cheap VPU op hidden under the
    # matmuls (avoids a separate wrapper-side HBM pass over x).
    x = x_ref[...].astype(jnp.bfloat16)                               # [TB, S]
    h1 = _sigmoid(jnp.dot(x, w1_ref[...],
                          preferred_element_type=jnp.float32) + b1_ref[...])
    h2 = _sigmoid(jnp.dot(h1.astype(jnp.bfloat16), w2_ref[...],
                          preferred_element_type=jnp.float32) + b2_ref[...])
    h3 = _sigmoid(jnp.dot(h2.astype(jnp.bfloat16), w3_ref[...],
                          preferred_element_type=jnp.float32) + b3_ref[...])
    a = _sigmoid(jnp.dot(h3.astype(jnp.bfloat16), w4_ref[...],
                         preferred_element_type=jnp.float32) + b4_ref[...])
    # bf16 store halves the dominant HBM writeback stream.
    out_ref[...] = a.astype(out_ref.dtype)


def prepare_actor_params(params, *, lane=128):
    """One-time bf16 cast + zero padding, hoisted out of the per-call path.

    Padding is mathematically exact:
      * h3 width 64 -> 128: padded w3 columns / b3 entries are 0, so padded
        units emit sigmoid(0)=0.5 which then multiplies zero rows of the
        padded w4 and contributes nothing.
      * final width action_dim -> 128: extra output lanes hold garbage
        (sigmoid of zero pre-activations) and are sliced off by the wrapper.
    """
    bf16 = jnp.bfloat16
    action_dim = params["w4"].shape[1]
    h3 = params["w3"].shape[1]
    h3_pad = _round_up(max(h3, lane), lane)
    out_pad = _round_up(max(action_dim, lane), lane)

    w1 = params["w1"].astype(bf16)
    b1 = params["b1"].astype(jnp.float32)
    w2 = params["w2"].astype(bf16)
    b2 = params["b2"].astype(jnp.float32)
    w3 = jnp.pad(params["w3"], ((0, 0), (0, h3_pad - h3))).astype(bf16)
    b3 = jnp.pad(params["b3"], ((0, 0), (0, h3_pad - h3))).astype(jnp.float32)
    w4 = jnp.pad(params["w4"],
                 ((0, h3_pad - h3), (0, out_pad - action_dim))).astype(bf16)
    b4 = jnp.pad(params["b4"],
                 ((0, 0), (0, out_pad - action_dim))).astype(jnp.float32)

    return dict(w1=w1, b1=b1, w2=w2, b2=b2, w3=w3, b3=b3, w4=w4, b4=b4,
                action_dim=int(action_dim), out_pad=int(out_pad))


def actor_forward(x, prepared, *, batch_tile=1024):
    """x: [batch, state_dim] float32; prepared: output of prepare_actor_params."""
    batch, state_dim = x.shape
    w1, b1 = prepared["w1"], prepared["b1"]
    w2, b2 = prepared["w2"], prepared["b2"]
    w3, b3 = prepared["w3"], prepared["b3"]
    w4, b4 = prepared["w4"], prepared["b4"]
    action_dim = prepared["action_dim"]
    out_pad = prepared["out_pad"]
    h1 = w1.shape[1]
    h2 = w2.shape[1]
    h3p = w3.shape[1]

    # Batch tiling: big tiles amortize the ~0.35 us/grid-step overhead, but
    #   (a) keep >=2 grid steps when the batch allows so both v7x TCs get work,
    #   (b) cap per-tile VMEM under the 32 MiB default scoped limit (tb<=4096).
    tb = min(batch_tile, _round_up(batch, 8))
    if batch >= 16 and pl.cdiv(batch, tb) < 2:
        tb = _round_up(pl.cdiv(batch, 2), 8)
    tb = min(tb, 4096)
    grid = (pl.cdiv(batch, tb),)   # ragged last block -> masked output store

    in_specs = [
        pl.BlockSpec((tb, state_dim), lambda i: (i, 0)),   # x: batch-tiled, f32
        pl.BlockSpec((state_dim, h1), lambda i: (0, 0)),   # w1: resident
        pl.BlockSpec((1, h1), lambda i: (0, 0)),           # b1
        pl.BlockSpec((h1, h2), lambda i: (0, 0)),          # w2
        pl.BlockSpec((1, h2), lambda i: (0, 0)),           # b2
        pl.BlockSpec((h2, h3p), lambda i: (0, 0)),         # w3 (lane-padded)
        pl.BlockSpec((1, h3p), lambda i: (0, 0)),          # b3 (lane-padded)
        pl.BlockSpec((h3p, out_pad), lambda i: (0, 0)),    # w4 (lane-padded)
        pl.BlockSpec((1, out_pad), lambda i: (0, 0)),      # b4 (lane-padded)
    ]
    out_specs = pl.BlockSpec((tb, out_pad), lambda i: (i, 0))

    flops = 2 * batch * (state_dim * h1 + h1 * h2 + h2 * h3p + h3p * out_pad)
    transcendentals = batch * (h1 + h2 + h3p + out_pad)
    bytes_accessed = (x.size * 4 + batch * out_pad * 2
                      + sum(int(w.size) * 2 for w in (w1, w2, w3, w4))
                      + sum(int(b.size) * 4 for b in (b1, b2, b3, b4)))

    out_padded = pl.pallas_call(
        actor_kernel,
        out_shape=jax.ShapeDtypeStruct((batch, out_pad), jnp.bfloat16),
        grid=grid,
        in_specs=in_specs,
        out_specs=out_specs,
        compiler_params=pltpu.CompilerParams(
            dimension_semantics=("parallel",)),   # shard batch across TCs
        cost_estimate=pl.CostEstimate(
            flops=int(flops),
            transcendentals=int(transcendentals),
            bytes_accessed=int(bytes_accessed)),
    )(x, w1, b1, w2, b2, w3, b3, w4, b4)

    # Slice off padded lanes (garbage = sigmoid(0)); return f32 for module
    # parity. Slice + convert fuse into a single pass over the bf16 output.
    return out_padded[:, :action_dim].astype(jnp.float32)


def init_actor_params(key, state_dim, action_dim):
    """Deterministic init mimicking PyTorch nn.Linear default:
    U(-1/sqrt(fan_in), 1/sqrt(fan_in)) for both weight and bias."""
    dims = [(state_dim, 256), (256, 128), (128, 64), (64, action_dim)]
    params = {}
    for idx, (fan_in, fan_out) in enumerate(dims, start=1):
        key, kw, kb = jax.random.split(key, 3)
        bound = 1.0 / math.sqrt(fan_in)
        params[f"w{idx}"] = jax.random.uniform(
            kw, (fan_in, fan_out), jnp.float32, minval=-bound, maxval=bound)
        # biases kept 2D [1, fan_out] so they tile cleanly and broadcast.
        params[f"b{idx}"] = jax.random.uniform(
            kb, (1, fan_out), jnp.float32, minval=-bound, maxval=bound)
    return params


def actor_reference(x, params):
    """Pure-JAX reference with the same bf16-weight / f32-accumulate recipe."""
    bf16 = jnp.bfloat16

    def layer(h, w, b):
        y = jnp.dot(h.astype(bf16), w.astype(bf16),
                    preferred_element_type=jnp.float32) + b
        return jax.nn.sigmoid(y)

    h = layer(x, params["w1"], params["b1"])
    h = layer(h, params["w2"], params["b2"])
    h = layer(h, params["w3"], params["b3"])
    return layer(h, params["w4"], params["b4"])


if __name__ == "__main__":
    state_dim = 32
    action_dim = 8
    batch = 8

    key = jax.random.PRNGKey(0)
    key, kx = jax.random.split(key)
    params = init_actor_params(key, state_dim, action_dim)
    x = jax.random.normal(kx, (batch, state_dim), jnp.float32)

    prepared = prepare_actor_params(params)      # hoisted one-time param prep
    out = actor_forward(x, prepared)
    out = jax.block_until_ready(out)

    ref = actor_reference(x, params)
    assert out.shape == (batch, action_dim), out.shape
    # Kernel and reference share the bf16-matmul recipe; the only extra error
    # is the final bf16 output cast (<= ~2e-3 absolute for sigmoid outputs).
    assert jnp.allclose(out, ref, atol=5e-3, rtol=5e-3), "mismatch vs reference"

    print("KERNEL_OK")
</pallas_src>

<mosaic_0001>
module attributes {stable_mosaic.version = 11 : i64} {
  func.func @actor_kernel(%arg0: i32, %arg1: memref<8x32xf32, #tpu.memory_space<vmem>>, %arg2: memref<32x256xbf16, #tpu.memory_space<vmem>>, %arg3: memref<1x256xf32, #tpu.memory_space<vmem>>, %arg4: memref<256x128xbf16, #tpu.memory_space<vmem>>, %arg5: memref<1x128xf32, #tpu.memory_space<vmem>>, %arg6: memref<128x128xbf16, #tpu.memory_space<vmem>>, %arg7: memref<1x128xf32, #tpu.memory_space<vmem>>, %arg8: memref<128x128xbf16, #tpu.memory_space<vmem>>, %arg9: memref<1x128xf32, #tpu.memory_space<vmem>>, %arg10: memref<8x128xbf16, #tpu.memory_space<vmem>>) attributes {dimension_semantics = [#tpu.dimension_semantics<parallel>], iteration_bounds = array<i64: 1>, scalar_prefetch = 0 : i64, scratch_operands = 0 : i64, tpu.core_type = #tpu.core_type<tc>, window_params = [{transform_indices = @transform_0, window_bounds = array<i64: 8, 32>}, {pipeline_mode = #tpu.pipeline_mode<synchronous>, transform_indices = @transform_1, window_bounds = array<i64: 32, 256>}, {pipeline_mode = #tpu.pipeline_mode<synchronous>, transform_indices = @transform_2, window_bounds = array<i64: 1, 256>}, {pipeline_mode = #tpu.pipeline_mode<synchronous>, transform_indices = @transform_3, window_bounds = array<i64: 256, 128>}, {pipeline_mode = #tpu.pipeline_mode<synchronous>, transform_indices = @transform_4, window_bounds = array<i64: 1, 128>}, {pipeline_mode = #tpu.pipeline_mode<synchronous>, transform_indices = @transform_5, window_bounds = array<i64: 128, 128>}, {pipeline_mode = #tpu.pipeline_mode<synchronous>, transform_indices = @transform_6, window_bounds = array<i64: 1, 128>}, {pipeline_mode = #tpu.pipeline_mode<synchronous>, transform_indices = @transform_7, window_bounds = array<i64: 128, 128>}, {pipeline_mode = #tpu.pipeline_mode<synchronous>, transform_indices = @transform_8, window_bounds = array<i64: 1, 128>}, {transform_indices = @transform_9, window_bounds = array<i64: 8, 128>}]} {
    %c0 = arith.constant 0 : index
    %c0_0 = arith.constant 0 : index
    %0 = vector.load %arg1[%c0, %c0_0] : memref<8x32xf32, #tpu.memory_space<vmem>>, vector<8x32xf32>
    %1 = arith.truncf %0 : vector<8x32xf32> to vector<8x32xbf16>
    %c0_1 = arith.constant 0 : index
    %c0_2 = arith.constant 0 : index
    %2 = vector.load %arg2[%c0_1, %c0_2] : memref<32x256xbf16, #tpu.memory_space<vmem>>, vector<32x256xbf16>
    %cst = arith.constant dense<0.000000e+00> : vector<8x256xf32>
    %3 = tpu.matmul %1, %2, %cst {dimension_numbers = #tpu.dot_dimension_numbers<[1], [0], [0], [1], [0, 0, 1, 1], [], []>} : vector<8x32xbf16>, vector<32x256xbf16>, vector<8x256xf32> -> vector<8x256xf32>
    %c0_3 = arith.constant 0 : index
    %c0_4 = arith.constant 0 : index
    %4 = vector.load %arg3[%c0_3, %c0_4] : memref<1x256xf32, #tpu.memory_space<vmem>>, vector<1x256xf32>
    %5 = vector.broadcast %4 : vector<1x256xf32> to vector<8x256xf32>
    %6 = arith.addf %3, %5 : vector<8x256xf32>
    %cst_5 = arith.constant 5.000000e-01 : f32
    %7 = vector.broadcast %cst_5 : f32 to vector<8x256xf32>
    %8 = arith.mulf %7, %6 : vector<8x256xf32>
    %9 = math.tanh %8 : vector<8x256xf32>
    %cst_6 = arith.constant 1.000000e+00 : f32
    %10 = vector.broadcast %cst_6 : f32 to vector<8x256xf32>
    %11 = arith.addf %9, %10 : vector<8x256xf32>
    %cst_7 = arith.constant 5.000000e-01 : f32
    %12 = vector.broadcast %cst_7 : f32 to vector<8x256xf32>
    %13 = arith.mulf %12, %11 : vector<8x256xf32>
    %14 = arith.truncf %13 : vector<8x256xf32> to vector<8x256xbf16>
    %c0_8 = arith.constant 0 : index
    %c0_9 = arith.constant 0 : index
    %15 = vector.load %arg4[%c0_8, %c0_9] : memref<256x128xbf16, #tpu.memory_space<vmem>>, vector<256x128xbf16>
    %cst_10 = arith.constant dense<0.000000e+00> : vector<8x128xf32>
    %16 = tpu.matmul %14, %15, %cst_10 {dimension_numbers = #tpu.dot_dimension_numbers<[1], [0], [0], [1], [0, 0, 1, 1], [], []>} : vector<8x256xbf16>, vector<256x128xbf16>, vector<8x128xf32> -> vector<8x128xf32>
    %c0_11 = arith.constant 0 : index
    %c0_12 = arith.constant 0 : index
    %17 = vector.load %arg5[%c0_11, %c0_12] : memref<1x128xf32, #tpu.memory_space<vmem>>, vector<1x128xf32>
    %18 = vector.broadcast %17 : vector<1x128xf32> to vector<8x128xf32>
    %19 = arith.addf %16, %18 : vector<8x128xf32>
    %cst_13 = arith.constant 5.000000e-01 : f32
    %20 = vector.broadcast %cst_13 : f32 to vector<8x128xf32>
    %21 = arith.mulf %20, %19 : vector<8x128xf32>
    %22 = math.tanh %21 : vector<8x128xf32>
    %cst_14 = arith.constant 1.000000e+00 : f32
    %23 = vector.broadcast %cst_14 : f32 to vector<8x128xf32>
    %24 = arith.addf %22, %23 : vector<8x128xf32>
    %cst_15 = arith.constant 5.000000e-01 : f32
    %25 = vector.broadcast %cst_15 : f32 to vector<8x128xf32>
    %26 = arith.mulf %25, %24 : vector<8x128xf32>
    %27 = arith.truncf %26 : vector<8x128xf32> to vector<8x128xbf16>
    %c0_16 = arith.constant 0 : index
    %c0_17 = arith.constant 0 : index
    %28 = vector.load %arg6[%c0_16, %c0_17] : memref<128x128xbf16, #tpu.memory_space<vmem>>, vector<128x128xbf16>
    %cst_18 = arith.constant dense<0.000000e+00> : vector<8x128xf32>
    %29 = tpu.matmul %27, %28, %cst_18 {dimension_numbers = #tpu.dot_dimension_numbers<[1], [0], [0], [1], [0, 0, 1, 1], [], []>} : vector<8x128xbf16>, vector<128x128xbf16>, vector<8x128xf32> -> vector<8x128xf32>
    %c0_19 = arith.constant 0 : index
    %c0_20 = arith.constant 0 : index
    %30 = vector.load %arg7[%c0_19, %c0_20] : memref<1x128xf32, #tpu.memory_space<vmem>>, vector<1x128xf32>
    %31 = vector.broadcast %30 : vector<1x128xf32> to vector<8x128xf32>
    %32 = arith.addf %29, %31 : vector<8x128xf32>
    %cst_21 = arith.constant 5.000000e-01 : f32
    %33 = vector.broadcast %cst_21 : f32 to vector<8x128xf32>
    %34 = arith.mulf %33, %32 : vector<8x128xf32>
    %35 = math.tanh %34 : vector<8x128xf32>
    %cst_22 = arith.constant 1.000000e+00 : f32
    %36 = vector.broadcast %cst_22 : f32 to vector<8x128xf32>
    %37 = arith.addf %35, %36 : vector<8x128xf32>
    %cst_23 = arith.constant 5.000000e-01 : f32
    %38 = vector.broadcast %cst_23 : f32 to vector<8x128xf32>
    %39 = arith.mulf %38, %37 : vector<8x128xf32>
    %40 = arith.truncf %39 : vector<8x128xf32> to vector<8x128xbf16>
    %c0_24 = arith.constant 0 : index
    %c0_25 = arith.constant 0 : index
    %41 = vector.load %arg8[%c0_24, %c0_25] : memref<128x128xbf16, #tpu.memory_space<vmem>>, vector<128x128xbf16>
    %cst_26 = arith.constant dense<0.000000e+00> : vector<8x128xf32>
    %42 = tpu.matmul %40, %41, %cst_26 {dimension_numbers = #tpu.dot_dimension_numbers<[1], [0], [0], [1], [0, 0, 1, 1], [], []>} : vector<8x128xbf16>, vector<128x128xbf16>, vector<8x128xf32> -> vector<8x128xf32>
    %c0_27 = arith.constant 0 : index
    %c0_28 = arith.constant 0 : index
    %43 = vector.load %arg9[%c0_27, %c0_28] : memref<1x128xf32, #tpu.memory_space<vmem>>, vector<1x128xf32>
    %44 = vector.broadcast %43 : vector<1x128xf32> to vector<8x128xf32>
    %45 = arith.addf %42, %44 : vector<8x128xf32>
    %cst_29 = arith.constant 5.000000e-01 : f32
    %46 = vector.broadcast %cst_29 : f32 to vector<8x128xf32>
    %47 = arith.mulf %46, %45 : vector<8x128xf32>
    %48 = math.tanh %47 : vector<8x128xf32>
    %cst_30 = arith.constant 1.000000e+00 : f32
    %49 = vector.broadcast %cst_30 : f32 to vector<8x128xf32>
    %50 = arith.addf %48, %49 : vector<8x128xf32>
    %cst_31 = arith.constant 5.000000e-01 : f32
    %51 = vector.broadcast %cst_31 : f32 to vector<8x128xf32>
    %52 = arith.mulf %51, %50 : vector<8x128xf32>
    %53 = arith.truncf %52 : vector<8x128xf32> to vector<8x128xbf16>
    %c0_32 = arith.constant 0 : index
    %c0_33 = arith.constant 0 : index
    %54 = vector.load %arg10[%c0_32, %c0_33] : memref<8x128xbf16, #tpu.memory_space<vmem>>, vector<8x128xbf16>
    tpu.vector_store %arg10[%c0_32, %c0_33], %53 {strides = array<i32>} : memref<8x128xbf16, #tpu.memory_space<vmem>>, vector<8x128xbf16>,
    return
  }
  func.func @transform_0(%arg0: i32) -> (i32, i32) {
    %c0_i32 = arith.constant 0 : i32
    %c0_i32_0 = arith.constant 0 : i32
    return %arg0, %c0_i32 : i32, i32
  }
  func.func @transform_1(%arg0: i32) -> (i32, i32) {
    %c0_i32 = arith.constant 0 : i32
    %c0_i32_0 = arith.constant 0 : i32
    %c0_i32_1 = arith.constant 0 : i32
    return %c0_i32, %c0_i32_0 : i32, i32
  }
  func.func @transform_2(%arg0: i32) -> (i32, i32) {
    %c0_i32 = arith.constant 0 : i32
    %c0_i32_0 = arith.constant 0 : i32
    %c0_i32_1 = arith.constant 0 : i32
    return %c0_i32, %c0_i32_0 : i32, i32
  }
  func.func @transform_3(%arg0: i32) -> (i32, i32) {
    %c0_i32 = arith.constant 0 : i32
    %c0_i32_0 = arith.constant 0 : i32
    %c0_i32_1 = arith.constant 0 : i32
    return %c0_i32, %c0_i32_0 : i32, i32
  }
  func.func @transform_4(%arg0: i32) -> (i32, i32) {
    %c0_i32 = arith.constant 0 : i32
    %c0_i32_0 = arith.constant 0 : i32
    %c0_i32_1 = arith.constant 0 : i32
    return %c0_i32, %c0_i32_0 : i32, i32
  }
  func.func @transform_5(%arg0: i32) -> (i32, i32) {
    %c0_i32 = arith.constant 0 : i32
    %c0_i32_0 = arith.constant 0 : i32
    %c0_i32_1 = arith.constant 0 : i32
    return %c0_i32, %c0_i32_0 : i32, i32
  }
  func.func @transform_6(%arg0: i32) -> (i32, i32) {
    %c0_i32 = arith.constant 0 : i32
    %c0_i32_0 = arith.constant 0 : i32
    %c0_i32_1 = arith.constant 0 : i32
    return %c0_i32, %c0_i32_0 : i32, i32
  }
  func.func @transform_7(%arg0: i32) -> (i32, i32) {
    %c0_i32 = arith.constant 0 : i32
    %c0_i32_0 = arith.constant 0 : i32
    %c0_i32_1 = arith.constant 0 : i32
    return %c0_i32, %c0_i32_0 : i32, i32
  }
  func.func @transform_8(%arg0: i32) -> (i32, i32) {
    %c0_i32 = arith.constant 0 : i32
    %c0_i32_0 = arith.constant 0 : i32
    %c0_i32_1 = arith.constant 0 : i32
    return %c0_i32, %c0_i32_0 : i32, i32
  }
  func.func @transform_9(%arg0: i32) -> (i32, i32) {
    %c0_i32 = arith.constant 0 : i32
    %c0_i32_0 = arith.constant 0 : i32
    return %arg0, %c0_i32 : i32, i32
  }
}

</mosaic_0001>

<bundles_post_ra>
// kernel: tpu_custom_call.1
= control target key start
LH: loop header
LB: loop body
LE: loop exit
PB: predicated region body
PF: predicated region fallthrough
CT: control target
= control target key end

     0   :  { %14 = vsyncpa [#allocation3], 0  ;;  %s1118_s0 = inlined_call_operand.hbm [shape: f32[8,32], index: 0, kind: input, shape index: {}]   ;;  %s1119_s1 = inlined_call_operand.hbm [shape: bf16[32,256], index: 1, kind: input, shape index: {}]   ;;  %s1120_s2 = inlined_call_operand.vmem [shape: f32[1,256], index: 2, kind: input, shape index: {}]   ;;  %s1121_s3 = inlined_call_operand.hbm [shape: bf16[256,128], index: 3, kind: input, shape index: {}]   ;;  %s1122_s4 = inlined_call_operand.vmem [shape: f32[1,128], index: 4, kind: input, shape index: {}]   ;;  %s1123_s5 = inlined_call_operand.hbm [shape: bf16[128,128], index: 5, kind: input, shape index: {}]   ;;  %s1124_s6 = inlined_call_operand.vmem [shape: f32[1,128], index: 6, kind: input, shape index: {}]   ;;  %s1125_s7 = inlined_call_operand.hbm [shape: bf16[128,128], index: 7, kind: input, shape index: {}]   ;;  %s1126_s8 = inlined_call_operand.vmem [shape: f32[1,128], index: 8, kind: input, shape index: {}]   ;;  %s1127_s9 = inlined_call_operand.hbm [shape: bf16[8,128], index: 9, kind: output, shape index: {}]  }
   0x1   :  { %15 = vsyncpa [#allocation6], 0 }
   0x2   :  { %16 = vsyncpa [#allocation9], 0 }
   0x3   :  { %17 = vsyncpa [#allocation4], 0  ;;  %s944_s30 = smov [#allocation5]   ;;  %s804_s13 = scalar_lea.hbm %s1119_s1, 512 }
   0x4   :  { %s33_s10 = sshll.u32 %s944_s30, 4  ;;  %p805_p0 = scmp.ne.s32.totalorder %s1119_s1, %s804_s13  ;;  %s34_s10 = int_to_ptr.vmem [resolvable:$true] %s33_s10 }
   0x5   :  { %p808_p1 = scmp.lt.u32.totalorder %s804_s13, %s1119_s1 }
   0x7   :  { %p810_p2 = pnand %p808_p1, %p805_p0 }
   0x9   :  { %813 = shalt.err (!%p810_p2)
}
   0xa   :  { %s814_s18 = scalar_lea.vmem %s34_s10, 512  ;;  %p819_p4 = scmp.lt.s32.totalorder %s34_s10, %s34_s10 }
   0xb   :  { %p815_p3 = scmp.ne.s32.totalorder %s34_s10, %s814_s18  ;;  %p820_p5 = scmp.lt.s32.totalorder %s814_s18, %s814_s18 }
   0xd   :  { %p821_p6 = por %p820_p5, %p819_p4 }
   0xf   :  { %p822_p7 = pnand %p821_p6, %p815_p3 }
  0x11   :  { %825 = shalt.err (!%p822_p7)
}
  0x12   :  { %s945_s19 = smov 128   ;;  %s946_s20 = smov 8  }
  0x13   :  { %39 = dma.hbm_to_vmem [thread:$0]  %s1119_s1, 512, %s34_s10, [#allocation6], %s945_s19, %s945_s19, %s946_s20  }
  0x14   :  { %s947_s23 = smov [#allocation8]   ;;  %s948_s25 = smov [#allocation2]  }
  0x15   :  { %s61_s24 = sshll.u32 %s947_s23, 4  ;;  %s24_s26 = sshll.u32 %s948_s25, 4  ;;  %s62_s24 = int_to_ptr.vmem [resolvable:$true] %s61_s24  ;;  %s25_s26 = int_to_ptr.vmem [resolvable:$true] %s24_s26 }
  0x16   :  { %s826_s29 = scalar_lea.hbm %s1123_s5, 1024 }
  0x17   :  { %p827_p8 = scmp.ne.s32.totalorder %s1123_s5, %s826_s29  ;;  %p830_p9 = scmp.lt.u32.totalorder %s826_s29, %s1123_s5 }
  0x19   :  { %p832_p10 = pnand %p830_p9, %p827_p8 }
  0x1b   :  { %835 = shalt.err (!%p832_p10)
}
  0x1c   :  { %s836_s1 = scalar_lea.vmem %s62_s24, 1024  ;;  %p841_p12 = scmp.lt.s32.totalorder %s62_s24, %s62_s24 }
  0x1d   :  { %p837_p11 = scmp.ne.s32.totalorder %s62_s24, %s836_s1  ;;  %p842_p13 = scmp.lt.s32.totalorder %s836_s1, %s836_s1 }
  0x1f   :  { %p843_p0 = por %p842_p13, %p841_p12 }
  0x21   :  { %p844_p1 = pnand %p843_p0, %p837_p11 }
  0x23   :  { %847 = shalt.err (!%p844_p1)
}
  0x24   :  { %s949_s10 = smov 64   ;;  %s950_s14 = smov 4  }
  0x25   :  { %67 = dma.hbm_to_vmem [thread:$0]  %s1123_s5, 1024, %s62_s24, [#allocation9], %s949_s10, %s949_s10, %s950_s14  }
  0x26   :  { %s848_s19 = scalar_lea.hbm %s1118_s0, 128 }
  0x27   :  { %p849_p2 = scmp.ne.s32.totalorder %s1118_s0, %s848_s19  ;;  %p852_p3 = scmp.lt.u32.totalorder %s848_s19, %s1118_s0 }
  0x29   :  { %p854_p4 = pnand %p852_p3, %p849_p2 }
  0x2b   :  { %857 = shalt.err (!%p854_p4)
}
  0x2c   :  { %s858_s25 = scalar_lea.vmem %s25_s26, 128  ;;  %p863_p6 = scmp.lt.s32.totalorder %s25_s26, %s25_s26 }
  0x2d   :  { %p859_p5 = scmp.ne.s32.totalorder %s25_s26, %s858_s25  ;;  %p864_p7 = scmp.lt.s32.totalorder %s858_s25, %s858_s25 }
  0x2f   :  { %p865_p8 = por %p864_p7, %p863_p6 }
  0x31   :  { %p866_p9 = pnand %p865_p8, %p859_p5 }
  0x33   :  { %869 = shalt.err (!%p866_p9)
}
  0x34   :  { %27 = dma.hbm_to_vmem [thread:$0]  %s1118_s0, 128, %s25_s26, [#allocation3]  }
  0x35   :  { %s951_s27 = smov [#allocation7]   ;;  %s952_s29 = smov [#allocation10]  }
  0x36   :  { %s47_s28 = sshll.u32 %s951_s27, 4  ;;  %s75_s30 = sshll.u32 %s952_s29, 4  ;;  %s48_s28 = int_to_ptr.vmem [resolvable:$true] %s47_s28  ;;  %s76_s30 = int_to_ptr.vmem [resolvable:$true] %s75_s30 }
  0x37   :  { %s870_s13 = scalar_lea.hbm %s1121_s3, 2048 }
  0x38   :  { %p871_p10 = scmp.ne.s32.totalorder %s1121_s3, %s870_s13  ;;  %p874_p11 = scmp.lt.u32.totalorder %s870_s13, %s1121_s3 }
  0x3a   :  { %p876_p12 = pnand %p874_p11, %p871_p10 }
  0x3c   :  { %879 = shalt.err (!%p876_p12)
}
  0x3d   :  { %s880_s0 = scalar_lea.vmem %s48_s28, 2048  ;;  %p885_p0 = scmp.lt.s32.totalorder %s48_s28, %s48_s28 }
  0x3e   :  { %p881_p13 = scmp.ne.s32.totalorder %s48_s28, %s880_s0  ;;  %p886_p1 = scmp.lt.s32.totalorder %s880_s0, %s880_s0 }
  0x40   :  { %p887_p2 = por %p886_p1, %p885_p0 }
  0x42   :  { %p888_p3 = pnand %p887_p2, %p881_p13 }
  0x44   :  { %891 = shalt.err (!%p888_p3)
}
  0x45   :  { %53 = dma.hbm_to_vmem [thread:$0]  %s1121_s3, 2048, %s48_s28, [#allocation6], %s949_s10, %s949_s10, %s950_s14  }
  0x46   :  { %s892_s21 = scalar_lea.hbm %s1125_s7, 1024 }
  0x47   :  { %p893_p4 = scmp.ne.s32.totalorder %s1125_s7, %s892_s21  ;;  %p896_p5 = scmp.lt.u32.totalorder %s892_s21, %s1125_s7 }
  0x49   :  { %p898_p6 = pnand %p896_p5, %p893_p4 }
  0x4b   :  { %901 = shalt.err (!%p898_p6)
}
  0x4c   :  { %s902_s24 = scalar_lea.vmem %s76_s30, 1024  ;;  %p907_p8 = scmp.lt.s32.totalorder %s76_s30, %s76_s30 }
  0x4d   :  { %p903_p7 = scmp.ne.s32.totalorder %s76_s30, %s902_s24  ;;  %p908_p9 = scmp.lt.s32.totalorder %s902_s24, %s902_s24 }
  0x4f   :  { %p909_p10 = por %p908_p9, %p907_p8 }
  0x51   :  { %p910_p11 = pnand %p909_p10, %p903_p7 }
  0x53   :  { %913 = shalt.err (!%p910_p11)
}
  0x54   :  { %81 = dma.hbm_to_vmem [thread:$0]  %s1125_s7, 1024, %s76_s30, [#allocation9], %s949_s10, %s949_s10, %s950_s14  }
  0x55   :  { %936 = dma.done.wait [#allocation3], 128  }
  0x56   :  { %937 = vsyncadd [#allocation3], 4294967168 }
  0x57   :  { %938 = dma.done.wait [#allocation6], 2560  }
  0x58   :  { %939 = vsyncadd [#allocation6], 4294964736 }
  0x59   :  { %940 = dma.done.wait [#allocation9], 2048  }
  0x5a   :  { %941 = vsyncadd [#allocation9], 4294965248  ;;  %v953_v0 = vmov 0   ;;  %v756_v1 = vld [vmem:[#allocation5 + $0x4] ss:$8 sps:$4 sm:$0xff]   ;;  %v100_v5 = vld [vmem:[#allocation2] sm:$0xff]  ;;  %v108_v26 = vlaneseq }
  0x5b   :  { %174 = vmatprep.mubr.bf16.mxu0 %v953_v0  ;;  %v758_v2 = vld [vmem:[#allocation5] ss:$8 sps:$4 sm:$0xff]   ;;  %142 = vmatprep.subr.bf16.mxu0 %v756_v1  ;;  %v759_v3 = vld [vmem:[#allocation5 + $0x14] ss:$8 sps:$4 sm:$0xff]   ;;  %v761_v4 = vld [vmem:[#allocation5 + $0x10] ss:$8 sps:$4 sm:$0xff]   ;;  %v101_v9 = vpack.c.bf16 %v100_v5, %v100_v5 }
  0x5c   :  { %143 = vmatpush1.bf16.msra.mxu0 %v758_v2  ;;  %v762_v6 = vld [vmem:[#allocation7 + $0x40] sm:$0xff]   ;;  %v764_v8 = vld [vmem:[#allocation7 + $0x48] sm:$0xff]   ;;  %vm138_vm0 = vcmask 261120   ;;  %v766_v11 = vld [vmem:[#allocation7 + $0x50] sm:$0xff]   ;;  %v954_v24 = vmov 0.0   ;;  %v109_v27 = vshrl.u32 %v108_v26, 7 }
  0x5d   :  { %144 = vmatprep.subr.bf16.mxu0 %v759_v3  ;;  %v763_v7 = vld [vmem:[#allocation7] sm:$0xff]   ;;  %663 = vmatprep.subr.bf16.mxu1 %v762_v6  ;;  %v765_v10 = vld [vmem:[#allocation7 + $0x8] sm:$0xff]   ;;  %v767_v12 = vld [vmem:[#allocation7 + $0x10] sm:$0xff]   ;;  %vm955_vm1 = vmmov 0  }
  0x5e   :  { %664 = vmatpush3.bf16.msra.mxu1 %v763_v7  ;;  %v768_v13 = vld [vmem:[#allocation7 + $0x58] sm:$0xff]   ;;  %v770_v15 = vld [vmem:[#allocation7 + $0x60] sm:$0xff]   ;;  %v772_v17 = vld [vmem:[#allocation7 + $0x68] sm:$0xff]   ;;  %v110_v28 = vsub.s32 0, %v109_v27  ;;  %v114_v30 = vsub.s32 1, %v109_v27 }
  0x5f   :  { %665 = vmatprep.subr.bf16.mxu1 %v764_v8  ;;  %v769_v14 = vld [vmem:[#allocation7 + $0x18] sm:$0xff]   ;;  %v771_v16 = vld [vmem:[#allocation7 + $0x20] sm:$0xff]   ;;  %v773_v18 = vld [vmem:[#allocation7 + $0x28] sm:$0xff]  }
  0x60   :  { %145 = vmatpush1.bf16.msra.mxu0 %v761_v4  ;;  %v774_v19 = vld [vmem:[#allocation7 + $0x70] sm:$0xff]   ;;  %v776_v21 = vld [vmem:[#allocation7 + $0x78] sm:$0xff]   ;;  %v778_v23 = vld [vmem:[#allocation8] sm:$0xff]  }
  0x61   :  { %v775_v20 = vld [vmem:[#allocation7 + $0x30] sm:$0xff]   ;;  %v777_v22 = vld [vmem:[#allocation7 + $0x38] sm:$0xff]   ;;  %703 = vmatprep.subr.bf16.mxu0 %v954_v24  ;;  %v779_v25 = vld [vmem:[#allocation8 + $0x8] sm:$0xff]  }
  0x62   :  { %666 = vmatpush3.bf16.msra.mxu1 %v765_v10  ;;  %v106_v29 = vld [vmem:[%s1120_s2] sm:$0x3]  ;;  %v780_v49 = vld [vmem:[#allocation8 + $0x10] sm:$0xff]   ;;  %v782_v51 = vld [vmem:[#allocation8 + $0x20] sm:$0xff]  }
  0x63   :  { %627 = vmatmul.mubr.msk.bf16.vlgmr.msra.gmra.mrb[0].mxu0 %vm138_vm0, %v101_v9  ;;  %667 = vmatprep.subr.bf16.mxu1 %v766_v11  ;;  %v111_v31 = vrot.slane %v106_v29, %v110_v28  ;;  %v115_v32 = vrot.slane %v106_v29, %v114_v30  ;;  %v781_v50 = vld [vmem:[#allocation8 + $0x18] sm:$0xff]   ;;  %v783_v52 = vld [vmem:[#allocation8 + $0x28] sm:$0xff]   ;;  %v784_v53 = vld [vmem:[#allocation8 + $0x30] sm:$0xff]  }
  0x64   :  { %704 = vmatpush3.bf16.msra.mxu0 %v778_v23  ;;  %v785_v54 = vld [vmem:[#allocation8 + $0x38] sm:$0xff]   ;;  %719 = vmatprep.mubr.msk.bf16.mxu0 %vm955_vm1, %v954_v24  ;;  %v786_v55 = vld [vmem:[#allocation10] sm:$0xff]   ;;  %v787_v56 = vld [vmem:[#allocation10 + $0x8] sm:$0xff]  }
  0x65   :  { %705 = vmatprep.subr.bf16.mxu0 %v954_v24  ;;  %v788_v57 = vld [vmem:[#allocation10 + $0x10] sm:$0xff]   ;;  %v628_v59 = vld [vmem:[%s1122_s4] ss:$0 sm:$0xff]  ;;  %v790_v7 = vld [vmem:[#allocation10 + $0x20] sm:$0xff]  }
  0x66   :  { %668 = vmatpush3.bf16.msra.mxu1 %v767_v12  ;;  %v789_v6 = vld [vmem:[#allocation10 + $0x18] sm:$0xff]   ;;  %v791_v8 = vld [vmem:[#allocation10 + $0x28] sm:$0xff]   ;;  %v792_v9 = vld [vmem:[#allocation10 + $0x30] sm:$0xff]  }
  0x67   :  { %669 = vmatprep.subr.bf16.mxu1 %v768_v13  ;;  %v793_v10 = vld [vmem:[#allocation10 + $0x38] sm:$0xff]  }
  0x68   :  { %706 = vmatpush3.bf16.msra.mxu0 %v779_v25  ;;  %v645_v11 = vld [vmem:[%s1124_s6] ss:$0 sm:$0xff]  ;;  %s956_s6 = smov [#allocation11]  }
  0x69   :  { %707 = vmatprep.subr.bf16.mxu0 %v954_v24  ;;  %s612_s11 = sshll.u32 %s956_s6, 4  ;;  %s613_s11 = int_to_ptr.vmem [resolvable:$true] %s612_s11 }
  0x6a   :  { %670 = vmatpush3.bf16.msra.mxu1 %v769_v14  ;;  %s914_s12 = scalar_lea.vmem %s613_s11, 64  ;;  %p919_p13 = scmp.lt.s32.totalorder %s613_s11, %s613_s11 }
  0x6b   :  { %671 = vmatprep.subr.bf16.mxu1 %v770_v15  ;;  %p915_p12 = scmp.ne.s32.totalorder %s613_s11, %s914_s12  ;;  %p920_p0 = scmp.lt.s32.totalorder %s914_s12, %s914_s12 }
  0x6c   :  { %708 = vmatpush3.bf16.msra.mxu0 %v780_v49 }
  0x6d   :  { %709 = vmatprep.subr.bf16.mxu0 %v954_v24  ;;  %p921_p1 = por %p920_p0, %p919_p13 }
  0x6e   :  { %672 = vmatpush3.bf16.msra.mxu1 %v771_v16 }
  0x6f   :  { %673 = vmatprep.subr.bf16.mxu1 %v772_v17  ;;  %p922_p2 = pnand %p921_p1, %p915_p12 }
  0x70   :  { %710 = vmatpush3.bf16.msra.mxu0 %v781_v50 }
  0x71   :  { %711 = vmatprep.subr.bf16.mxu0 %v954_v24 }
  0x72   :  { %674 = vmatpush3.bf16.msra.mxu1 %v773_v18 }
  0x73   :  { %675 = vmatprep.subr.bf16.mxu1 %v774_v19 }
  0x74   :  { %712 = vmatpush3.bf16.msra.mxu0 %v782_v51 }
  0x75   :  { %713 = vmatprep.subr.bf16.mxu0 %v954_v24 }
  0x76   :  { %676 = vmatpush3.bf16.msra.mxu1 %v775_v20 }
  0x77   :  { %677 = vmatprep.subr.bf16.mxu1 %v776_v21 }
  0x78   :  { %714 = vmatpush3.bf16.msra.mxu0 %v783_v52 }
  0x79   :  { %715 = vmatprep.subr.bf16.mxu0 %v954_v24 }
  0x7a   :  { %678 = vmatpush3.bf16.msra.mxu1 %v777_v22  ;;  %v654_v22 = vld [vmem:[%s1126_s8] ss:$0 sm:$0xff] }
  0x7b   :  { %723 = vmatprep.subr.bf16.mxu1 %v954_v24 }
  0x7c   :  { %716 = vmatpush3.bf16.msra.mxu0 %v784_v53 }
  0x7d   :  { %717 = vmatprep.subr.bf16.mxu0 %v954_v24 }
  0x80   :  { %718 = vmatpush3.bf16.msra.mxu0 %v785_v54 }
 0x136   :  { %v176_v33 = vpop.f32.mrb[0].mxu0 }
 0x137   :  { %v177_v34 = vadd.f32 %v176_v33, %v111_v31  ;;  %v178_v35 = vpop.f32.mrb[1].mxu0 }
 0x138   :  { %v179_v36 = vadd.f32 %v178_v35, %v115_v32  ;;  %v180_v37 = vpop.f32.mrb[2].mxu0 }
 0x139   :  { %v183_v38 = vmul.f32 0.5, %v177_v34  ;;  %v181_v39 = vpop.f32.mrb[3].mxu0 }
 0x13a   :  { %v184_v40 = vmul.f32 0.5, %v179_v36 }
 0x13b   :  { %794 = vtanh.f32 %v183_v38 }
 0x13c   :  { %796 = vtanh.f32 %v184_v40 }
 0x145   :  { %v795_v41 = vpop.eup %794 }
 0x146   :  { %v797_v42 = vpop.eup %796  ;;  %v187_v43 = vadd.f32 1.0, %v795_v41 }
 0x147   :  { %v188_v44 = vadd.f32 1.0, %v797_v42 }
 0x148   :  { %v189_v45 = vmul.f32 0.5, %v187_v43 }
 0x149   :  { %v190_v46 = vmul.f32 0.5, %v188_v44 }
 0x14a   :  { %v191_v48 = vpack.c.bf16 %v189_v45, %v189_v45 }
 0x14b   :  { %v192_v47 = vpack.c.bf16 %v190_v46, %v190_v46 }
 0x14d   :  { %360 = vmatprep.mubr.bf16.mxu1 %v192_v47 }
 0x14e   :  { %361 = vmatmul.mubr.bf16.vlgmr.msra.gmra.mrb[0].mxu1 %v191_v48 }
 0x14f   :  { %739 = vmatprep.mubr.msk.bf16.mxu1 %vm955_vm1, %v954_v24  ;;  %724 = vmatpush3.bf16.msra.mxu1 %v786_v55 }
 0x150   :  { %725 = vmatprep.subr.bf16.mxu1 %v954_v24 }
 0x153   :  { %726 = vmatpush3.bf16.msra.mxu1 %v787_v56 }
 0x154   :  { %727 = vmatprep.subr.bf16.mxu1 %v954_v24 }
 0x157   :  { %728 = vmatpush3.bf16.msra.mxu1 %v788_v57 }
 0x158   :  { %729 = vmatprep.subr.bf16.mxu1 %v954_v24 }
 0x15b   :  { %730 = vmatpush3.bf16.msra.mxu1 %v789_v6 }
 0x15c   :  { %731 = vmatprep.subr.bf16.mxu1 %v954_v24 }
 0x15f   :  { %732 = vmatpush3.bf16.msra.mxu1 %v790_v7 }
 0x160   :  { %733 = vmatprep.subr.bf16.mxu1 %v954_v24 }
 0x163   :  { %734 = vmatpush3.bf16.msra.mxu1 %v791_v8 }
 0x164   :  { %735 = vmatprep.subr.bf16.mxu1 %v954_v24 }
 0x167   :  { %736 = vmatpush3.bf16.msra.mxu1 %v792_v9 }
 0x168   :  { %737 = vmatprep.subr.bf16.mxu1 %v954_v24 }
 0x16b   :  { %738 = vmatpush3.bf16.msra.mxu1 %v793_v10 }
 0x221   :  { %v679_v58 = vpop.f32.mrb[0].mxu1 }
 0x222   :  { %v680_v60 = vpop.f32.mrb[1].mxu1 }
 0x223   :  { %v681_v61 = vadd.f32 %v680_v60, %v679_v58  ;;  %v682_v62 = vpop.f32.mrb[2].mxu1 }
 0x224   :  { %v683_v63 = vpop.f32.mrb[3].mxu1 }
 0x225   :  { %v363_v0 = vadd.f32 %v681_v61, %v628_v59 }
 0x227   :  { %v368_v1 = vmul.f32 0.5, %v363_v0 }
 0x229   :  { %798 = vtanh.f32 %v368_v1 }
 0x233   :  { %v799_v2 = vpop.eup %798 }
 0x234   :  { %v370_v3 = vadd.f32 1.0, %v799_v2 }
 0x236   :  { %v371_v4 = vmul.f32 0.5, %v370_v3 }
 0x238   :  { %v372_v5 = vpack.c.bf16 %v371_v4, %v371_v4 }
 0x23a   :  { %720 = vmatmul.mubr.bf16.vlgmr.msra.gmra.mrb[4].mxu0 %v372_v5 }
 0x30d   :  { %v478_v12 = vpop.f32.mrb[4].mxu0 }
 0x30e   :  { %v479_v13 = vadd.f32 %v645_v11, %v478_v12  ;;  %v721_v14 = vpop.f32.mrb[5].mxu0 }
 0x30f   :  { %v481_v15 = vpop.f32.mrb[6].mxu0 }
 0x310   :  { %v484_v16 = vmul.f32 0.5, %v479_v13  ;;  %v722_v17 = vpop.f32.mrb[7].mxu0 }
 0x312   :  { %800 = vtanh.f32 %v484_v16 }
 0x31c   :  { %v801_v18 = vpop.eup %800 }
 0x31d   :  { %v486_v19 = vadd.f32 1.0, %v801_v18 }
 0x31f   :  { %v487_v20 = vmul.f32 0.5, %v486_v19 }
 0x321   :  { %v488_v21 = vpack.c.bf16 %v487_v20, %v487_v20 }
 0x323   :  { %740 = vmatmul.mubr.bf16.vlgmr.msra.gmra.mrb[4].mxu1 %v488_v21 }
 0x3f6   :  { %v594_v23 = vpop.f32.mrb[4].mxu1 }
 0x3f7   :  { %v595_v24 = vadd.f32 %v654_v22, %v594_v23  ;;  %v741_v25 = vpop.f32.mrb[5].mxu1 }
 0x3f8   :  { %v597_v26 = vpop.f32.mrb[6].mxu1 }
 0x3f9   :  { %v600_v27 = vmul.f32 0.5, %v595_v24  ;;  %v742_v28 = vpop.f32.mrb[7].mxu1 }
 0x3fb   :  { %802 = vtanh.f32 %v600_v27 }
 0x405   :  { %v803_v29 = vpop.eup %802 }
 0x406   :  { %v602_v30 = vadd.f32 1.0, %v803_v29 }
 0x408   :  { %v603_v31 = vmul.f32 0.5, %v602_v30 }
 0x40a   :  { %v604_v32 = vpack.c.bf16 %v603_v31, %v603_v31 }
 0x40c   :  { %605 = vst [vmem:[#allocation11] sm:$0xf] %v604_v32 }
 0x40d   :  { %925 = shalt.err (!%p922_p2)
}
 0x40e   :  { %s926_s1 = scalar_lea.hbm %s1127_s9, 64 }
 0x40f   :  { %p927_p3 = scmp.ne.s32.totalorder %s1127_s9, %s926_s1  ;;  %p930_p4 = scmp.lt.u32.totalorder %s926_s1, %s1127_s9 }
 0x411   :  { %p932_p5 = pnand %p930_p4, %p927_p3 }
 0x413   :  { %935 = shalt.err (!%p932_p5)
}
 0x414   :  { %615 = dma.vmem_to_hbm [thread:$0]  %s613_s11, 64, %s1127_s9, [#allocation4]  }
 0x415   :  { %942 = dma.done.wait [#allocation4], 64  }
 0x416   :  { %943 = vsyncadd [#allocation4], 4294967232 }
 0x417   :  { %619 = vsyncpa [#allocation3], 1 }
 0x418   :  { %620 = vsyncpa [#allocation6], 1 }
 0x419   :  { %621 = vsyncpa [#allocation9], 1 }
 0x41a   :  { %622 = vsyncpa [#allocation4], 1 }

</bundles_post_ra>
